<compile_context>
chip_gen: v6e
topology: v6e:2x2x1
jax: 0.10.0
libtpu: 0.0.40
codegen_flags: <defaults>
</compile_context>

<pallas_src>
import jax
import jax.numpy as jnp
from jax.experimental import pallas as pl
from jax.experimental.pallas import tpu as pltpu

_BLOCK_BYTES = 4 * 1024 * 1024        # ~4 MiB per block (in and out)
_VMEM_LIMIT_BYTES = 32 * 1024 * 1024  # safe on v5e/v6e (128 MiB) and v7x (64 MiB)


def _flatten_copy_kernel(x_ref, o_ref):
    # Pure pass-through: one tile per grid step. Mem-bound identity copy;
    # all the performance is in the (lane-dense) BlockSpec tiling.
    o_ref[...] = x_ref[...]


def _tiled_copy(arr, block_shape, grid, index_map, dim_semantics):
    """Pipelined identity copy of `arr` with the given tiling."""
    n_bytes = arr.size * arr.dtype.itemsize
    return pl.pallas_call(
        _flatten_copy_kernel,
        out_shape=jax.ShapeDtypeStruct(arr.shape, arr.dtype),
        grid_spec=pltpu.PrefetchScalarGridSpec(
            num_scalar_prefetch=0,
            grid=grid,
            in_specs=[pl.BlockSpec(block_shape, index_map)],
            out_specs=pl.BlockSpec(block_shape, index_map),
        ),
        compiler_params=pltpu.CompilerParams(
            dimension_semantics=dim_semantics,
            vmem_limit_bytes=_VMEM_LIMIT_BYTES,
        ),
        # Pure memory op: 0 flops, read + write the whole tensor once.
        cost_estimate=pl.CostEstimate(
            flops=0, transcendentals=0, bytes_accessed=2 * n_bytes),
    )(arr)


def _largest_divisor(n, candidates):
    for c in candidates:
        if c <= n and n % c == 0:
            return c
    return None


def flatten_forward(x):
    """nn.Flatten forward: (B, d1, d2, ...) -> (B, d1*d2*...)."""
    B = x.shape[0]
    F = 1
    for d in x.shape[1:]:
        F *= d
    N = B * F
    itemsize = jnp.dtype(x.dtype).itemsize

    # Metadata-only reshape to the logical output shape (no data movement).
    x2 = x.reshape(B, F)

    # Dtype-aware minimum sublane tile: 8 rows (f32), 16 (bf16), 32 (int8/fp8).
    min_rows = max(8, 32 // itemsize)

    # --- Main path: lane-dense 1D slab (R, L), L a large multiple of 128. -----
    lane_cands = (32768, 16384, 8192, 4096, 2048, 1024, 512, 256, 128)
    L = _largest_divisor(N, lane_cands) if N % 128 == 0 else None

    if L is not None:
        R = N // L
        slab = x2.reshape(R, L)  # metadata-only (row-major)

        # Rows per block targeting ~4 MiB, aligned to the dtype's sublane packing.
        max_rows = max(min_rows, _BLOCK_BYTES // (L * itemsize))
        tile_r = max(min_rows, (max_rows // min_rows) * min_rows)

        if tile_r >= R:
            if R >= 2 * min_rows:
                # Split the row axis so both v7x TensorCores get a block.
                half = pl.cdiv(R, 2)
                tile_r = ((half + min_rows - 1) // min_rows) * min_rows
            else:
                tile_r = R  # full extent: always a legal block dim

        grid = (pl.cdiv(R, tile_r),)
        out = _tiled_copy(
            slab,
            block_shape=(tile_r, L),
            grid=grid,
            index_map=lambda i: (i, 0),
            dim_semantics=("parallel",),
        )
        return out.reshape(B, F)  # metadata-only

    # --- Fallback: N not a multiple of 128 — tile the logical (B, F) view. ----
    # Fixed, aligned tiles + cdiv handle ragged edges; full extent used only
    # when the dim itself is small (always legal, never VMEM-busting).
    if F <= 2048:
        tile_f = F                       # full extent (F not 128-divisible here)
    else:
        tile_f = 2048                    # 128-aligned, ragged edge masked

    if B <= 8:
        tile_b = B                       # full extent
    else:
        budget_rows = max(min_rows, _BLOCK_BYTES // (tile_f * itemsize))
        tile_b = max(min_rows, (budget_rows // min_rows) * min_rows)
        tile_b = min(tile_b, ((B + min_rows - 1) // min_rows) * min_rows)

    grid = (pl.cdiv(B, tile_b), pl.cdiv(F, tile_f))
    out = _tiled_copy(
        x2,
        block_shape=(tile_b, tile_f),
        grid=grid,
        index_map=lambda i, j: (i, j),
        dim_semantics=("parallel", "parallel"),
    )
    return out


if __name__ == "__main__":
    key = jax.random.PRNGKey(0)
    B, C, H, W = 2, 4, 16, 16
    x = jax.random.normal(key, (B, C, H, W), dtype=jnp.float32)

    y = flatten_forward(x)
    jax.block_until_ready(y)

    # Reference: exactly what nn.Flatten() does (keep batch dim, flatten rest).
    y_ref = x.reshape(B, C * H * W)
    assert y.shape == (B, C * H * W)
    assert jnp.array_equal(y, y_ref), "mismatch vs reference"

    print("KERNEL_OK")
</pallas_src>

<mosaic_0001>
module attributes {stable_mosaic.version = 11 : i64} {
  func.func @_flatten_copy_kernel(%arg0: i32, %arg1: memref<1x2048xf32, #tpu.memory_space<vmem>>, %arg2: memref<1x2048xf32, #tpu.memory_space<vmem>>) attributes {dimension_semantics = [#tpu.dimension_semantics<parallel>], iteration_bounds = array<i64: 1>, scalar_prefetch = 0 : i64, scratch_operands = 0 : i64, tpu.core_type = #tpu.core_type<tc>, window_params = [{transform_indices = @transform_0, window_bounds = array<i64: 1, 2048>}, {transform_indices = @transform_1, window_bounds = array<i64: 1, 2048>}]} {
    %c0 = arith.constant 0 : index
    %c0_0 = arith.constant 0 : index
    %0 = vector.load %arg1[%c0, %c0_0] : memref<1x2048xf32, #tpu.memory_space<vmem>>, vector<1x2048xf32>
    %c0_1 = arith.constant 0 : index
    %c0_2 = arith.constant 0 : index
    %1 = vector.load %arg2[%c0_1, %c0_2] : memref<1x2048xf32, #tpu.memory_space<vmem>>, vector<1x2048xf32>
    tpu.vector_store %arg2[%c0_1, %c0_2], %0 {strides = array<i32>} : memref<1x2048xf32, #tpu.memory_space<vmem>>, vector<1x2048xf32>,
    return
  }
  func.func @transform_0(%arg0: i32) -> (i32, i32) {
    %c0_i32 = arith.constant 0 : i32
    %c0_i32_0 = arith.constant 0 : i32
    return %arg0, %c0_i32 : i32, i32
  }
  func.func @transform_1(%arg0: i32) -> (i32, i32) {
    %c0_i32 = arith.constant 0 : i32
    %c0_i32_0 = arith.constant 0 : i32
    return %arg0, %c0_i32 : i32, i32
  }
}

</mosaic_0001>

<bundles_post_ra>
// kernel: tpu_custom_call.1
= control target key start
LH: loop header
LB: loop body
LE: loop exit
PB: predicated region body
PF: predicated region fallthrough
CT: control target
= control target key end

     0   :  { %6 = vsyncpa [#allocation3], 0  ;;  %s104_s0 = inlined_call_operand.hbm [shape: f32[1,2048], index: 0, kind: input, shape index: {}]   ;;  %s105_s1 = inlined_call_operand.hbm [shape: f32[1,2048], index: 1, kind: output, shape index: {}]  }
   0x1   :  { %7 = vsyncpa [#allocation4], 0  ;;  %s86_s6 = smov [#allocation2]  }
   0x2   :  { %s14_s7 = sshll.u32 %s86_s6, 4  ;;  %s15_s7 = int_to_ptr.vmem [resolvable:$true] %s14_s7 }
   0x3   :  { %s50_s8 = scalar_lea.vmem %s15_s7, 256  ;;  %p55_p1 = scmp.lt.s32.totalorder %s15_s7, %s15_s7 }
   0x4   :  { %p51_p0 = scmp.ne.s32.totalorder %s15_s7, %s50_s8  ;;  %p56_p2 = scmp.lt.s32.totalorder %s50_s8, %s50_s8 }
   0x6   :  { %p57_p3 = por %p56_p2, %p55_p1 }
   0x8   :  { %p58_p4 = pnand %p57_p3, %p51_p0 }
   0xa   :  { %61 = shalt.err (!%p58_p4)
}
   0xb   :  { %17 = dma.hbm_to_vmem [thread:$0]  %s104_s0, 256, %s15_s7, [#allocation3]  }
   0xc   :  { %82 = dma.done.wait [#allocation3], 256  }
   0xd   :  { %83 = vsyncadd [#allocation3], 4294967040  ;;  %s87_s11 = smov [#allocation5]   ;;  %v21_v0 = vld [vmem:[#allocation2] sm:$0xff]  ;;  %v22_v1 = vld [vmem:[#allocation2 + $0x8] sm:$0xff] }
   0xe   :  { %s31_s12 = sshll.u32 %s87_s11, 4  ;;  %23 = vst [vmem:[#allocation5] sm:$0xff] %v21_v0  ;;  %24 = vst [vmem:[#allocation5 + $0x8] sm:$0xff] %v22_v1  ;;  %s32_s12 = int_to_ptr.vmem [resolvable:$true] %s31_s12 }
   0xf   :  { %s62_s13 = scalar_lea.vmem %s32_s12, 256  ;;  %p67_p6 = scmp.lt.s32.totalorder %s32_s12, %s32_s12 }
  0x10   :  { %p63_p5 = scmp.ne.s32.totalorder %s32_s12, %s62_s13  ;;  %p68_p7 = scmp.lt.s32.totalorder %s62_s13, %s62_s13 }
  0x12   :  { %p69_p8 = por %p68_p7, %p67_p6 }
  0x14   :  { %p70_p9 = pnand %p69_p8, %p63_p5 }
  0x16   :  { %73 = shalt.err (!%p70_p9)
}
  0x17   :  { %34 = dma.vmem_to_hbm [thread:$0]  %s32_s12, 256, %s105_s1, [#allocation4]  }
  0x18   :  { %84 = dma.done.wait [#allocation4], 256  }
  0x19   :  { %85 = vsyncadd [#allocation4], 4294967040 }
  0x1a   :  { %38 = vsyncpa [#allocation3], 1 }
  0x1b   :  { %39 = vsyncpa [#allocation4], 1 }

</bundles_post_ra>
